<compile_context>
chip_gen: v7x
topology: tpu7x:2x2x1
jax: 0.10.0
libtpu: 0.0.40
codegen_flags: <defaults>
</compile_context>

<pallas_src>
import functools

import jax
import jax.numpy as jnp
import numpy as np
from jax import lax
from jax.experimental import pallas as pl
from jax.experimental.pallas import tpu as pltpu


# ----------------------------------------------------------------------------
# Kernel 1: LSTM recurrence.  Single grid step; time loop is in-kernel.
#   xwb : (T, B, 4H)  precomputed  W_ih^T[token] + (b_ih + b_hh)
#   whh : (H, 4H)     W_hh^T
#   y   : (T, B, H)   per-step hidden states (fed to the projection kernel)
#   hn/cn : (B, H)    final state
# ----------------------------------------------------------------------------
def _lstm_recurrence_kernel(xwb_ref, h0_ref, c0_ref, whh_ref,
                            y_ref, hn_ref, cn_ref, *, hidden, seq):
    H = hidden
    whh = whh_ref[...]                                   # (H, 4H), VMEM-resident

    def step(t, carry):
        h_prev, c_prev = carry
        # gates = (one-hot gather + biases, precomputed)  +  h_prev @ W_hh^T
        gates = xwb_ref[t] + jnp.dot(h_prev, whh,
                                     preferred_element_type=jnp.float32)  # (B, 4H)
        # One full-width sigmoid pass (i/f/o lanes), one narrow tanh (g lanes).
        sig = jax.nn.sigmoid(gates)
        # NOTE: sub-128-lane slices below are only cheap because 4H fits one
        # vreg at these sizes; for production configs pad H to a multiple of 128.
        i_g = sig[:, 0 * H:1 * H]
        f_g = sig[:, 1 * H:2 * H]
        o_g = sig[:, 3 * H:4 * H]
        g_g = jnp.tanh(gates[:, 2 * H:3 * H])

        c_new = f_g * c_prev + i_g * g_g
        h_new = o_g * jnp.tanh(c_new)
        y_ref[t] = h_new
        return (h_new, c_new)

    # Short, fixed trip count -> fully unroll so the scheduler sees everything.
    h_n, c_n = lax.fori_loop(0, seq, step, (h0_ref[...], c0_ref[...]),
                             unroll=True)
    hn_ref[...] = h_n
    cn_ref[...] = c_n


# ----------------------------------------------------------------------------
# Kernel 2: output projection  out = Y2d @ W_lin^T + b_lin   (no recurrence,
# fully parallel tiles -> MXU-friendly, both TensorCores usable on v7x).
# ----------------------------------------------------------------------------
def _proj_kernel(y_ref, w_ref, b_ref, o_ref):
    o_ref[...] = (jnp.dot(y_ref[...], w_ref[...],
                          preferred_element_type=jnp.float32) + b_ref[...])


def _pick_tile(n, candidates=(512, 256, 128)):
    for c in candidates:
        if n % c == 0:
            return c
    return n


def _linear_projection(y2d, w_t, b_row):
    M, H = y2d.shape
    _, N = w_t.shape
    tm = _pick_tile(M)
    tn = _pick_tile(N)
    return pl.pallas_call(
        _proj_kernel,
        out_shape=jax.ShapeDtypeStruct((M, N), jnp.float32),
        grid_spec=pltpu.PrefetchScalarGridSpec(
            num_scalar_prefetch=0,
            grid=(M // tm, N // tn),
            in_specs=[
                pl.BlockSpec((tm, H), lambda i, j: (i, 0)),
                pl.BlockSpec((H, tn), lambda i, j: (0, j)),
                pl.BlockSpec((1, tn), lambda i, j: (0, j)),
            ],
            out_specs=pl.BlockSpec((tm, tn), lambda i, j: (i, j)),
        ),
        compiler_params=pltpu.CompilerParams(
            dimension_semantics=("parallel", "parallel")),
    )(y2d, w_t, b_row)


# ----------------------------------------------------------------------------
# Wrapper mirroring RNNModel.forward(input, state) for a 1-layer unidirectional
# LSTM:  output (T*B, V) rows seq-major, state = (h_n, c_n) each (1, B, H).
# ----------------------------------------------------------------------------
def rnn_model_forward(tokens, state, params):
    w_ih, w_hh, b_ih, b_hh, w_lin, b_lin = (
        params["w_ih"], params["w_hh"], params["b_ih"], params["b_hh"],
        params["w_lin"], params["b_lin"])
    hidden = w_hh.shape[1]
    vocab = w_lin.shape[0]
    B, T = tokens.shape

    # --- JAX glue: one-hot @ W_ih^T == row gather of W_ih^T; fold both biases in.
    wih_t = w_ih.T                                                     # (V, 4H)
    xwb = (jnp.take(wih_t, tokens.T.astype(jnp.int32), axis=0)
           + (b_ih + b_hh)).astype(jnp.float32)                        # (T, B, 4H)
    h0 = state[0][0].astype(jnp.float32)                               # (B, H)
    c0 = state[1][0].astype(jnp.float32)                               # (B, H)
    whh_t = w_hh.T.astype(jnp.float32)                                 # (H, 4H)

    kernel = functools.partial(_lstm_recurrence_kernel, hidden=hidden, seq=T)
    vmem = pltpu.MemorySpace.VMEM
    y, h_n, c_n = pl.pallas_call(
        kernel,
        out_shape=(
            jax.ShapeDtypeStruct((T, B, hidden), jnp.float32),
            jax.ShapeDtypeStruct((B, hidden), jnp.float32),
            jax.ShapeDtypeStruct((B, hidden), jnp.float32),
        ),
        in_specs=[pl.BlockSpec(memory_space=vmem)] * 4,
        out_specs=(pl.BlockSpec(memory_space=vmem),) * 3,
    )(xwb, h0, c0, whh_t)

    # --- separate, parallel output projection: (T*B, H) @ (H, V) + b
    y2d = y.reshape(T * B, hidden)
    out = _linear_projection(
        y2d,
        w_lin.T.astype(jnp.float32),
        b_lin.reshape(1, vocab).astype(jnp.float32),
    )
    return out, (h_n[None], c_n[None])


# ----------------------------------------------------------------------------
# Pure-JAX reference mirroring the PyTorch module.
# ----------------------------------------------------------------------------
def _reference_forward(tokens, state, params):
    vocab = params["w_ih"].shape[1]
    hidden = params["w_hh"].shape[1]
    X = jax.nn.one_hot(tokens.T, vocab, dtype=jnp.float32)   # (T, B, V)
    h, c = state[0][0], state[1][0]

    def step(carry, x_t):
        h, c = carry
        g = (x_t @ params["w_ih"].T + params["b_ih"]
             + h @ params["w_hh"].T + params["b_hh"])
        i = jax.nn.sigmoid(g[:, :hidden])
        f = jax.nn.sigmoid(g[:, hidden:2 * hidden])
        gg = jnp.tanh(g[:, 2 * hidden:3 * hidden])
        o = jax.nn.sigmoid(g[:, 3 * hidden:])
        c_new = f * c + i * gg
        h_new = o * jnp.tanh(c_new)
        return (h_new, c_new), h_new

    (h_n, c_n), Y = jax.lax.scan(step, (h, c), X)
    out = Y.reshape(-1, hidden) @ params["w_lin"].T + params["b_lin"]
    return out, (h_n[None], c_n[None])


def init_params(key, vocab, hidden):
    ks = jax.random.split(key, 6)
    s = 1.0 / np.sqrt(hidden)
    u = lambda k, shape: jax.random.uniform(k, shape, jnp.float32, -s, s)
    return {
        "w_ih": u(ks[0], (4 * hidden, vocab)),
        "w_hh": u(ks[1], (4 * hidden, hidden)),
        "b_ih": u(ks[2], (4 * hidden,)),
        "b_hh": u(ks[3], (4 * hidden,)),
        "w_lin": u(ks[4], (vocab, hidden)),
        "b_lin": u(ks[5], (vocab,)),
    }


if __name__ == "__main__":
    VOCAB, HIDDEN, BATCH, SEQ = 32, 32, 8, 8

    key = jax.random.PRNGKey(0)
    k_tok, k_par = jax.random.split(key)
    params = init_params(k_par, VOCAB, HIDDEN)

    tokens = jax.random.randint(k_tok, (BATCH, SEQ), 0, VOCAB, dtype=jnp.int32)
    # begin_state for LSTM: (h0, c0) of shape (num_dirs*num_layers=1, B, H)
    state = (jnp.zeros((1, BATCH, HIDDEN), jnp.float32),
             jnp.zeros((1, BATCH, HIDDEN), jnp.float32))

    out, (h_n, c_n) = rnn_model_forward(tokens, state, params)
    jax.block_until_ready((out, h_n, c_n))

    ref_out, (ref_h, ref_c) = _reference_forward(tokens, state, params)
    np.testing.assert_allclose(np.asarray(out), np.asarray(ref_out), atol=1e-4, rtol=1e-4)
    np.testing.assert_allclose(np.asarray(h_n), np.asarray(ref_h), atol=1e-4, rtol=1e-4)
    np.testing.assert_allclose(np.asarray(c_n), np.asarray(ref_c), atol=1e-4, rtol=1e-4)

    assert out.shape == (SEQ * BATCH, VOCAB)
    assert h_n.shape == (1, BATCH, HIDDEN) and c_n.shape == (1, BATCH, HIDDEN)
    print("KERNEL_OK")
</pallas_src>

<mosaic_0001>
module attributes {stable_mosaic.version = 11 : i64} {
  func.func @_lstm_recurrence_kernel(%arg0: memref<8x8x128xf32, #tpu.memory_space<vmem>>, %arg1: memref<8x32xf32, #tpu.memory_space<vmem>>, %arg2: memref<8x32xf32, #tpu.memory_space<vmem>>, %arg3: memref<32x128xf32, #tpu.memory_space<vmem>>, %arg4: memref<8x8x32xf32, #tpu.memory_space<vmem>>, %arg5: memref<8x32xf32, #tpu.memory_space<vmem>>, %arg6: memref<8x32xf32, #tpu.memory_space<vmem>>) attributes {dimension_semantics = [], scalar_prefetch = 0 : i64, scratch_operands = 0 : i64, tpu.core_type = #tpu.core_type<tc>} {
    %c0 = arith.constant 0 : index
    %c0_0 = arith.constant 0 : index
    %0 = vector.load %arg3[%c0, %c0_0] : memref<32x128xf32, #tpu.memory_space<vmem>>, vector<32x128xf32>
    %c0_1 = arith.constant 0 : index
    %c0_2 = arith.constant 0 : index
    %1 = vector.load %arg1[%c0_1, %c0_2] : memref<8x32xf32, #tpu.memory_space<vmem>>, vector<8x32xf32>
    %c0_3 = arith.constant 0 : index
    %c0_4 = arith.constant 0 : index
    %2 = vector.load %arg2[%c0_3, %c0_4] : memref<8x32xf32, #tpu.memory_space<vmem>>, vector<8x32xf32>
    %c0_i32 = arith.constant 0 : i32
    %3 = arith.index_cast %c0_i32 : i32 to index
    %c0_5 = arith.constant 0 : index
    %c0_6 = arith.constant 0 : index
    %4 = vector.load %arg0[%3, %c0_5, %c0_6] : memref<8x8x128xf32, #tpu.memory_space<vmem>>, vector<1x8x128xf32>
    %5 = vector.shape_cast %4 : vector<1x8x128xf32> to vector<8x128xf32>
    %cst = arith.constant dense<0.000000e+00> : vector<8x128xf32>
    %6 = tpu.matmul %1, %0, %cst {dimension_numbers = #tpu.dot_dimension_numbers<[1], [0], [0], [1], [0, 0, 1, 1], [], []>} : vector<8x32xf32>, vector<32x128xf32>, vector<8x128xf32> -> vector<8x128xf32>
    %7 = arith.addf %5, %6 : vector<8x128xf32>
    %8 = arith.negf %7 : vector<8x128xf32>
    %9 = math.exp %8 : vector<8x128xf32>
    %cst_7 = arith.constant 1.000000e+00 : f32
    %10 = vector.broadcast %cst_7 : f32 to vector<8x128xf32>
    %11 = arith.addf %10, %9 : vector<8x128xf32>
    %12 = arith.divf %10, %11 : vector<8x128xf32>
    %13 = vector.extract_strided_slice %12 {offsets = [0, 0], sizes = [8, 32], strides = [1, 1]} : vector<8x128xf32> to vector<8x32xf32>
    %14 = vector.extract_strided_slice %12 {offsets = [0, 32], sizes = [8, 32], strides = [1, 1]} : vector<8x128xf32> to vector<8x32xf32>
    %15 = vector.extract_strided_slice %12 {offsets = [0, 96], sizes = [8, 32], strides = [1, 1]} : vector<8x128xf32> to vector<8x32xf32>
    %16 = vector.extract_strided_slice %7 {offsets = [0, 64], sizes = [8, 32], strides = [1, 1]} : vector<8x128xf32> to vector<8x32xf32>
    %17 = math.tanh %16 : vector<8x32xf32>
    %18 = arith.mulf %14, %2 : vector<8x32xf32>
    %19 = arith.mulf %13, %17 : vector<8x32xf32>
    %20 = arith.addf %18, %19 : vector<8x32xf32>
    %21 = math.tanh %20 : vector<8x32xf32>
    %22 = arith.mulf %15, %21 : vector<8x32xf32>
    %23 = arith.index_cast %c0_i32 : i32 to index
    %c0_8 = arith.constant 0 : index
    %c0_9 = arith.constant 0 : index
    %24 = vector.load %arg4[%23, %c0_8, %c0_9] : memref<8x8x32xf32, #tpu.memory_space<vmem>>, vector<1x8x32xf32>
    %25 = vector.shape_cast %24 : vector<1x8x32xf32> to vector<8x32xf32>
    %26 = vector.shape_cast %22 : vector<8x32xf32> to vector<1x8x32xf32>
    tpu.vector_store %arg4[%23, %c0_8, %c0_9], %26 {strides = array<i32>} : memref<8x8x32xf32, #tpu.memory_space<vmem>>, vector<1x8x32xf32>,
    %c1_i32 = arith.constant 1 : i32
    %27 = arith.index_cast %c1_i32 : i32 to index
    %c0_10 = arith.constant 0 : index
    %c0_11 = arith.constant 0 : index
    %28 = vector.load %arg0[%27, %c0_10, %c0_11] : memref<8x8x128xf32, #tpu.memory_space<vmem>>, vector<1x8x128xf32>
    %29 = vector.shape_cast %28 : vector<1x8x128xf32> to vector<8x128xf32>
    %cst_12 = arith.constant dense<0.000000e+00> : vector<8x128xf32>
    %30 = tpu.matmul %22, %0, %cst_12 {dimension_numbers = #tpu.dot_dimension_numbers<[1], [0], [0], [1], [0, 0, 1, 1], [], []>} : vector<8x32xf32>, vector<32x128xf32>, vector<8x128xf32> -> vector<8x128xf32>
    %31 = arith.addf %29, %30 : vector<8x128xf32>
    %32 = arith.negf %31 : vector<8x128xf32>
    %33 = math.exp %32 : vector<8x128xf32>
    %cst_13 = arith.constant 1.000000e+00 : f32
    %34 = vector.broadcast %cst_13 : f32 to vector<8x128xf32>
    %35 = arith.addf %34, %33 : vector<8x128xf32>
    %36 = arith.divf %34, %35 : vector<8x128xf32>
    %37 = vector.extract_strided_slice %36 {offsets = [0, 0], sizes = [8, 32], strides = [1, 1]} : vector<8x128xf32> to vector<8x32xf32>
    %38 = vector.extract_strided_slice %36 {offsets = [0, 32], sizes = [8, 32], strides = [1, 1]} : vector<8x128xf32> to vector<8x32xf32>
    %39 = vector.extract_strided_slice %36 {offsets = [0, 96], sizes = [8, 32], strides = [1, 1]} : vector<8x128xf32> to vector<8x32xf32>
    %40 = vector.extract_strided_slice %31 {offsets = [0, 64], sizes = [8, 32], strides = [1, 1]} : vector<8x128xf32> to vector<8x32xf32>
    %41 = math.tanh %40 : vector<8x32xf32>
    %42 = arith.mulf %38, %20 : vector<8x32xf32>
    %43 = arith.mulf %37, %41 : vector<8x32xf32>
    %44 = arith.addf %42, %43 : vector<8x32xf32>
    %45 = math.tanh %44 : vector<8x32xf32>
    %46 = arith.mulf %39, %45 : vector<8x32xf32>
    %47 = arith.index_cast %c1_i32 : i32 to index
    %c0_14 = arith.constant 0 : index
    %c0_15 = arith.constant 0 : index
    %48 = vector.load %arg4[%47, %c0_14, %c0_15] : memref<8x8x32xf32, #tpu.memory_space<vmem>>, vector<1x8x32xf32>
    %49 = vector.shape_cast %48 : vector<1x8x32xf32> to vector<8x32xf32>
    %50 = vector.shape_cast %46 : vector<8x32xf32> to vector<1x8x32xf32>
    tpu.vector_store %arg4[%47, %c0_14, %c0_15], %50 {strides = array<i32>} : memref<8x8x32xf32, #tpu.memory_space<vmem>>, vector<1x8x32xf32>,
    %c2_i32 = arith.constant 2 : i32
    %51 = arith.index_cast %c2_i32 : i32 to index
    %c0_16 = arith.constant 0 : index
    %c0_17 = arith.constant 0 : index
    %52 = vector.load %arg0[%51, %c0_16, %c0_17] : memref<8x8x128xf32, #tpu.memory_space<vmem>>, vector<1x8x128xf32>
    %53 = vector.shape_cast %52 : vector<1x8x128xf32> to vector<8x128xf32>
    %cst_18 = arith.constant dense<0.000000e+00> : vector<8x128xf32>
    %54 = tpu.matmul %46, %0, %cst_18 {dimension_numbers = #tpu.dot_dimension_numbers<[1], [0], [0], [1], [0, 0, 1, 1], [], []>} : vector<8x32xf32>, vector<32x128xf32>, vector<8x128xf32> -> vector<8x128xf32>
    %55 = arith.addf %53, %54 : vector<8x128xf32>
    %56 = arith.negf %55 : vector<8x128xf32>
    %57 = math.exp %56 : vector<8x128xf32>
    %cst_19 = arith.constant 1.000000e+00 : f32
    %58 = vector.broadcast %cst_19 : f32 to vector<8x128xf32>
    %59 = arith.addf %58, %57 : vector<8x128xf32>
    %60 = arith.divf %58, %59 : vector<8x128xf32>
    %61 = vector.extract_strided_slice %60 {offsets = [0, 0], sizes = [8, 32], strides = [1, 1]} : vector<8x128xf32> to vector<8x32xf32>
    %62 = vector.extract_strided_slice %60 {offsets = [0, 32], sizes = [8, 32], strides = [1, 1]} : vector<8x128xf32> to vector<8x32xf32>
    %63 = vector.extract_strided_slice %60 {offsets = [0, 96], sizes = [8, 32], strides = [1, 1]} : vector<8x128xf32> to vector<8x32xf32>
    %64 = vector.extract_strided_slice %55 {offsets = [0, 64], sizes = [8, 32], strides = [1, 1]} : vector<8x128xf32> to vector<8x32xf32>
    %65 = math.tanh %64 : vector<8x32xf32>
    %66 = arith.mulf %62, %44 : vector<8x32xf32>
    %67 = arith.mulf %61, %65 : vector<8x32xf32>
    %68 = arith.addf %66, %67 : vector<8x32xf32>
    %69 = math.tanh %68 : vector<8x32xf32>
    %70 = arith.mulf %63, %69 : vector<8x32xf32>
    %71 = arith.index_cast %c2_i32 : i32 to index
    %c0_20 = arith.constant 0 : index
    %c0_21 = arith.constant 0 : index
    %72 = vector.load %arg4[%71, %c0_20, %c0_21] : memref<8x8x32xf32, #tpu.memory_space<vmem>>, vector<1x8x32xf32>
    %73 = vector.shape_cast %72 : vector<1x8x32xf32> to vector<8x32xf32>
    %74 = vector.shape_cast %70 : vector<8x32xf32> to vector<1x8x32xf32>
    tpu.vector_store %arg4[%71, %c0_20, %c0_21], %74 {strides = array<i32>} : memref<8x8x32xf32, #tpu.memory_space<vmem>>, vector<1x8x32xf32>,
    %c3_i32 = arith.constant 3 : i32
    %75 = arith.index_cast %c3_i32 : i32 to index
    %c0_22 = arith.constant 0 : index
    %c0_23 = arith.constant 0 : index
    %76 = vector.load %arg0[%75, %c0_22, %c0_23] : memref<8x8x128xf32, #tpu.memory_space<vmem>>, vector<1x8x128xf32>
    %77 = vector.shape_cast %76 : vector<1x8x128xf32> to vector<8x128xf32>
    %cst_24 = arith.constant dense<0.000000e+00> : vector<8x128xf32>
    %78 = tpu.matmul %70, %0, %cst_24 {dimension_numbers = #tpu.dot_dimension_numbers<[1], [0], [0], [1], [0, 0, 1, 1], [], []>} : vector<8x32xf32>, vector<32x128xf32>, vector<8x128xf32> -> vector<8x128xf32>
    %79 = arith.addf %77, %78 : vector<8x128xf32>
    %80 = arith.negf %79 : vector<8x128xf32>
    %81 = math.exp %80 : vector<8x128xf32>
    %cst_25 = arith.constant 1.000000e+00 : f32
    %82 = vector.broadcast %cst_25 : f32 to vector<8x128xf32>
    %83 = arith.addf %82, %81 : vector<8x128xf32>
    %84 = arith.divf %82, %83 : vector<8x128xf32>
    %85 = vector.extract_strided_slice %84 {offsets = [0, 0], sizes = [8, 32], strides = [1, 1]} : vector<8x128xf32> to vector<8x32xf32>
    %86 = vector.extract_strided_slice %84 {offsets = [0, 32], sizes = [8, 32], strides = [1, 1]} : vector<8x128xf32> to vector<8x32xf32>
    %87 = vector.extract_strided_slice %84 {offsets = [0, 96], sizes = [8, 32], strides = [1, 1]} : vector<8x128xf32> to vector<8x32xf32>
    %88 = vector.extract_strided_slice %79 {offsets = [0, 64], sizes = [8, 32], strides = [1, 1]} : vector<8x128xf32> to vector<8x32xf32>
    %89 = math.tanh %88 : vector<8x32xf32>
    %90 = arith.mulf %86, %68 : vector<8x32xf32>
    %91 = arith.mulf %85, %89 : vector<8x32xf32>
    %92 = arith.addf %90, %91 : vector<8x32xf32>
    %93 = math.tanh %92 : vector<8x32xf32>
    %94 = arith.mulf %87, %93 : vector<8x32xf32>
    %95 = arith.index_cast %c3_i32 : i32 to index
    %c0_26 = arith.constant 0 : index
    %c0_27 = arith.constant 0 : index
    %96 = vector.load %arg4[%95, %c0_26, %c0_27] : memref<8x8x32xf32, #tpu.memory_space<vmem>>, vector<1x8x32xf32>
    %97 = vector.shape_cast %96 : vector<1x8x32xf32> to vector<8x32xf32>
    %98 = vector.shape_cast %94 : vector<8x32xf32> to vector<1x8x32xf32>
    tpu.vector_store %arg4[%95, %c0_26, %c0_27], %98 {strides = array<i32>} : memref<8x8x32xf32, #tpu.memory_space<vmem>>, vector<1x8x32xf32>,
    %c4_i32 = arith.constant 4 : i32
    %99 = arith.index_cast %c4_i32 : i32 to index
    %c0_28 = arith.constant 0 : index
    %c0_29 = arith.constant 0 : index
    %100 = vector.load %arg0[%99, %c0_28, %c0_29] : memref<8x8x128xf32, #tpu.memory_space<vmem>>, vector<1x8x128xf32>
    %101 = vector.shape_cast %100 : vector<1x8x128xf32> to vector<8x128xf32>
    %cst_30 = arith.constant dense<0.000000e+00> : vector<8x128xf32>
    %102 = tpu.matmul %94, %0, %cst_30 {dimension_numbers = #tpu.dot_dimension_numbers<[1], [0], [0], [1], [0, 0, 1, 1], [], []>} : vector<8x32xf32>, vector<32x128xf32>, vector<8x128xf32> -> vector<8x128xf32>
    %103 = arith.addf %101, %102 : vector<8x128xf32>
    %104 = arith.negf %103 : vector<8x128xf32>
    %105 = math.exp %104 : vector<8x128xf32>
    %cst_31 = arith.constant 1.000000e+00 : f32
    %106 = vector.broadcast %cst_31 : f32 to vector<8x128xf32>
    %107 = arith.addf %106, %105 : vector<8x128xf32>
    %108 = arith.divf %106, %107 : vector<8x128xf32>
    %109 = vector.extract_strided_slice %108 {offsets = [0, 0], sizes = [8, 32], strides = [1, 1]} : vector<8x128xf32> to vector<8x32xf32>
    %110 = vector.extract_strided_slice %108 {offsets = [0, 32], sizes = [8, 32], strides = [1, 1]} : vector<8x128xf32> to vector<8x32xf32>
    %111 = vector.extract_strided_slice %108 {offsets = [0, 96], sizes = [8, 32], strides = [1, 1]} : vector<8x128xf32> to vector<8x32xf32>
    %112 = vector.extract_strided_slice %103 {offsets = [0, 64], sizes = [8, 32], strides = [1, 1]} : vector<8x128xf32> to vector<8x32xf32>
    %113 = math.tanh %112 : vector<8x32xf32>
    %114 = arith.mulf %110, %92 : vector<8x32xf32>
    %115 = arith.mulf %109, %113 : vector<8x32xf32>
    %116 = arith.addf %114, %115 : vector<8x32xf32>
    %117 = math.tanh %116 : vector<8x32xf32>
    %118 = arith.mulf %111, %117 : vector<8x32xf32>
    %119 = arith.index_cast %c4_i32 : i32 to index
    %c0_32 = arith.constant 0 : index
    %c0_33 = arith.constant 0 : index
    %120 = vector.load %arg4[%119, %c0_32, %c0_33] : memref<8x8x32xf32, #tpu.memory_space<vmem>>, vector<1x8x32xf32>
    %121 = vector.shape_cast %120 : vector<1x8x32xf32> to vector<8x32xf32>
    %122 = vector.shape_cast %118 : vector<8x32xf32> to vector<1x8x32xf32>
    tpu.vector_store %arg4[%119, %c0_32, %c0_33], %122 {strides = array<i32>} : memref<8x8x32xf32, #tpu.memory_space<vmem>>, vector<1x8x32xf32>,
    %c5_i32 = arith.constant 5 : i32
    %123 = arith.index_cast %c5_i32 : i32 to index
    %c0_34 = arith.constant 0 : index
    %c0_35 = arith.constant 0 : index
    %124 = vector.load %arg0[%123, %c0_34, %c0_35] : memref<8x8x128xf32, #tpu.memory_space<vmem>>, vector<1x8x128xf32>
    %125 = vector.shape_cast %124 : vector<1x8x128xf32> to vector<8x128xf32>
    %cst_36 = arith.constant dense<0.000000e+00> : vector<8x128xf32>
    %126 = tpu.matmul %118, %0, %cst_36 {dimension_numbers = #tpu.dot_dimension_numbers<[1], [0], [0], [1], [0, 0, 1, 1], [], []>} : vector<8x32xf32>, vector<32x128xf32>, vector<8x128xf32> -> vector<8x128xf32>
    %127 = arith.addf %125, %126 : vector<8x128xf32>
    %128 = arith.negf %127 : vector<8x128xf32>
    %129 = math.exp %128 : vector<8x128xf32>
    %cst_37 = arith.constant 1.000000e+00 : f32
    %130 = vector.broadcast %cst_37 : f32 to vector<8x128xf32>
    %131 = arith.addf %130, %129 : vector<8x128xf32>
    %132 = arith.divf %130, %131 : vector<8x128xf32>
    %133 = vector.extract_strided_slice %132 {offsets = [0, 0], sizes = [8, 32], strides = [1, 1]} : vector<8x128xf32> to vector<8x32xf32>
    %134 = vector.extract_strided_slice %132 {offsets = [0, 32], sizes = [8, 32], strides = [1, 1]} : vector<8x128xf32> to vector<8x32xf32>
    %135 = vector.extract_strided_slice %132 {offsets = [0, 96], sizes = [8, 32], strides = [1, 1]} : vector<8x128xf32> to vector<8x32xf32>
    %136 = vector.extract_strided_slice %127 {offsets = [0, 64], sizes = [8, 32], strides = [1, 1]} : vector<8x128xf32> to vector<8x32xf32>
    %137 = math.tanh %136 : vector<8x32xf32>
    %138 = arith.mulf %134, %116 : vector<8x32xf32>
    %139 = arith.mulf %133, %137 : vector<8x32xf32>
    %140 = arith.addf %138, %139 : vector<8x32xf32>
    %141 = math.tanh %140 : vector<8x32xf32>
    %142 = arith.mulf %135, %141 : vector<8x32xf32>
    %143 = arith.index_cast %c5_i32 : i32 to index
    %c0_38 = arith.constant 0 : index
    %c0_39 = arith.constant 0 : index
    %144 = vector.load %arg4[%143, %c0_38, %c0_39] : memref<8x8x32xf32, #tpu.memory_space<vmem>>, vector<1x8x32xf32>
    %145 = vector.shape_cast %144 : vector<1x8x32xf32> to vector<8x32xf32>
    %146 = vector.shape_cast %142 : vector<8x32xf32> to vector<1x8x32xf32>
    tpu.vector_store %arg4[%143, %c0_38, %c0_39], %146 {strides = array<i32>} : memref<8x8x32xf32, #tpu.memory_space<vmem>>, vector<1x8x32xf32>,
    %c6_i32 = arith.constant 6 : i32
    %147 = arith.index_cast %c6_i32 : i32 to index
    %c0_40 = arith.constant 0 : index
    %c0_41 = arith.constant 0 : index
    %148 = vector.load %arg0[%147, %c0_40, %c0_41] : memref<8x8x128xf32, #tpu.memory_space<vmem>>, vector<1x8x128xf32>
    %149 = vector.shape_cast %148 : vector<1x8x128xf32> to vector<8x128xf32>
    %cst_42 = arith.constant dense<0.000000e+00> : vector<8x128xf32>
    %150 = tpu.matmul %142, %0, %cst_42 {dimension_numbers = #tpu.dot_dimension_numbers<[1], [0], [0], [1], [0, 0, 1, 1], [], []>} : vector<8x32xf32>, vector<32x128xf32>, vector<8x128xf32> -> vector<8x128xf32>
    %151 = arith.addf %149, %150 : vector<8x128xf32>
    %152 = arith.negf %151 : vector<8x128xf32>
    %153 = math.exp %152 : vector<8x128xf32>
    %cst_43 = arith.constant 1.000000e+00 : f32
    %154 = vector.broadcast %cst_43 : f32 to vector<8x128xf32>
    %155 = arith.addf %154, %153 : vector<8x128xf32>
    %156 = arith.divf %154, %155 : vector<8x128xf32>
    %157 = vector.extract_strided_slice %156 {offsets = [0, 0], sizes = [8, 32], strides = [1, 1]} : vector<8x128xf32> to vector<8x32xf32>
    %158 = vector.extract_strided_slice %156 {offsets = [0, 32], sizes = [8, 32], strides = [1, 1]} : vector<8x128xf32> to vector<8x32xf32>
    %159 = vector.extract_strided_slice %156 {offsets = [0, 96], sizes = [8, 32], strides = [1, 1]} : vector<8x128xf32> to vector<8x32xf32>
    %160 = vector.extract_strided_slice %151 {offsets = [0, 64], sizes = [8, 32], strides = [1, 1]} : vector<8x128xf32> to vector<8x32xf32>
    %161 = math.tanh %160 : vector<8x32xf32>
    %162 = arith.mulf %158, %140 : vector<8x32xf32>
    %163 = arith.mulf %157, %161 : vector<8x32xf32>
    %164 = arith.addf %162, %163 : vector<8x32xf32>
    %165 = math.tanh %164 : vector<8x32xf32>
    %166 = arith.mulf %159, %165 : vector<8x32xf32>
    %167 = arith.index_cast %c6_i32 : i32 to index
    %c0_44 = arith.constant 0 : index
    %c0_45 = arith.constant 0 : index
    %168 = vector.load %arg4[%167, %c0_44, %c0_45] : memref<8x8x32xf32, #tpu.memory_space<vmem>>, vector<1x8x32xf32>
    %169 = vector.shape_cast %168 : vector<1x8x32xf32> to vector<8x32xf32>
    %170 = vector.shape_cast %166 : vector<8x32xf32> to vector<1x8x32xf32>
    tpu.vector_store %arg4[%167, %c0_44, %c0_45], %170 {strides = array<i32>} : memref<8x8x32xf32, #tpu.memory_space<vmem>>, vector<1x8x32xf32>,
    %c7_i32 = arith.constant 7 : i32
    %171 = arith.index_cast %c7_i32 : i32 to index
    %c0_46 = arith.constant 0 : index
    %c0_47 = arith.constant 0 : index
    %172 = vector.load %arg0[%171, %c0_46, %c0_47] : memref<8x8x128xf32, #tpu.memory_space<vmem>>, vector<1x8x128xf32>
    %173 = vector.shape_cast %172 : vector<1x8x128xf32> to vector<8x128xf32>
    %cst_48 = arith.constant dense<0.000000e+00> : vector<8x128xf32>
    %174 = tpu.matmul %166, %0, %cst_48 {dimension_numbers = #tpu.dot_dimension_numbers<[1], [0], [0], [1], [0, 0, 1, 1], [], []>} : vector<8x32xf32>, vector<32x128xf32>, vector<8x128xf32> -> vector<8x128xf32>
    %175 = arith.addf %173, %174 : vector<8x128xf32>
    %176 = arith.negf %175 : vector<8x128xf32>
    %177 = math.exp %176 : vector<8x128xf32>
    %cst_49 = arith.constant 1.000000e+00 : f32
    %178 = vector.broadcast %cst_49 : f32 to vector<8x128xf32>
    %179 = arith.addf %178, %177 : vector<8x128xf32>
    %180 = arith.divf %178, %179 : vector<8x128xf32>
    %181 = vector.extract_strided_slice %180 {offsets = [0, 0], sizes = [8, 32], strides = [1, 1]} : vector<8x128xf32> to vector<8x32xf32>
    %182 = vector.extract_strided_slice %180 {offsets = [0, 32], sizes = [8, 32], strides = [1, 1]} : vector<8x128xf32> to vector<8x32xf32>
    %183 = vector.extract_strided_slice %180 {offsets = [0, 96], sizes = [8, 32], strides = [1, 1]} : vector<8x128xf32> to vector<8x32xf32>
    %184 = vector.extract_strided_slice %175 {offsets = [0, 64], sizes = [8, 32], strides = [1, 1]} : vector<8x128xf32> to vector<8x32xf32>
    %185 = math.tanh %184 : vector<8x32xf32>
    %186 = arith.mulf %182, %164 : vector<8x32xf32>
    %187 = arith.mulf %181, %185 : vector<8x32xf32>
    %188 = arith.addf %186, %187 : vector<8x32xf32>
    %189 = math.tanh %188 : vector<8x32xf32>
    %190 = arith.mulf %183, %189 : vector<8x32xf32>
    %191 = arith.index_cast %c7_i32 : i32 to index
    %c0_50 = arith.constant 0 : index
    %c0_51 = arith.constant 0 : index
    %192 = vector.load %arg4[%191, %c0_50, %c0_51] : memref<8x8x32xf32, #tpu.memory_space<vmem>>, vector<1x8x32xf32>
    %193 = vector.shape_cast %192 : vector<1x8x32xf32> to vector<8x32xf32>
    %194 = vector.shape_cast %190 : vector<8x32xf32> to vector<1x8x32xf32>
    tpu.vector_store %arg4[%191, %c0_50, %c0_51], %194 {strides = array<i32>} : memref<8x8x32xf32, #tpu.memory_space<vmem>>, vector<1x8x32xf32>,
    %c8_i32 = arith.constant 8 : i32
    %c0_52 = arith.constant 0 : index
    %c0_53 = arith.constant 0 : index
    %195 = vector.load %arg5[%c0_52, %c0_53] : memref<8x32xf32, #tpu.memory_space<vmem>>, vector<8x32xf32>
    tpu.vector_store %arg5[%c0_52, %c0_53], %190 {strides = array<i32>} : memref<8x32xf32, #tpu.memory_space<vmem>>, vector<8x32xf32>,
    %c0_54 = arith.constant 0 : index
    %c0_55 = arith.constant 0 : index
    %196 = vector.load %arg6[%c0_54, %c0_55] : memref<8x32xf32, #tpu.memory_space<vmem>>, vector<8x32xf32>
    tpu.vector_store %arg6[%c0_54, %c0_55], %188 {strides = array<i32>} : memref<8x32xf32, #tpu.memory_space<vmem>>, vector<8x32xf32>,
    return
  }
}

</mosaic_0001>

<bundles_post_ra>
// kernel: tpu_custom_call.1
= control target key start
LH: loop header
LB: loop body
LE: loop exit
PB: predicated region body
PF: predicated region fallthrough
CT: control target
= control target key end

     0   :  { %12 = vsyncpa [#allocation3], 0  ;;  %s1684_s0 = inlined_call_operand.hbm [shape: f32[8,8,128], index: 0, kind: input, shape index: {}]   ;;  %s1685_s1 = inlined_call_operand.hbm [shape: f32[8,32], index: 1, kind: input, shape index: {}]   ;;  %s1686_s2 = inlined_call_operand.hbm [shape: f32[8,32], index: 2, kind: input, shape index: {}]   ;;  %s1687_s3 = inlined_call_operand.hbm [shape: f32[32,128], index: 3, kind: input, shape index: {}]   ;;  %s1688_s4 = inlined_call_operand.hbm [shape: f32[8,8,32], index: 4, kind: output, shape index: {0}]   ;;  %s1689_s5 = inlined_call_operand.hbm [shape: f32[8,32], index: 5, kind: output, shape index: {1}]   ;;  %s1690_s6 = inlined_call_operand.hbm [shape: f32[8,32], index: 6, kind: output, shape index: {2}]  }
   0x1   :  { %13 = vsyncpa [#allocation6], 0 }
   0x2   :  { %14 = vsyncpa [#allocation9], 0 }
   0x3   :  { %15 = vsyncpa [#allocation4], 0 }
   0x4   :  { %16 = vsyncpa [#allocation12], 0  ;;  %s1410_s21 = smov [#allocation5]   ;;  %s1411_s23 = smov [#allocation2]  }
   0x5   :  { %s35_s22 = sshll.u32 %s1410_s21, 4  ;;  %s22_s24 = sshll.u32 %s1411_s23, 4  ;;  %s36_s22 = int_to_ptr.vmem [resolvable:$true] %s35_s22  ;;  %s1460_s24 = int_to_ptr.vmem [resolvable:$true] %s22_s24 }
   0x6   :  { %s1246_s27 = scalar_lea.hbm %s1685_s1, 128 }
   0x7   :  { %p1247_p0 = scmp.ne.s32.totalorder %s1685_s1, %s1246_s27  ;;  %p1250_p1 = scmp.lt.u32.totalorder %s1246_s27, %s1685_s1 }
   0x9   :  { %p1252_p2 = pnand %p1250_p1, %p1247_p0 }
   0xb   :  { %1255 = shalt.err (!%p1252_p2)
}
   0xc   :  { %s1256_s8 = scalar_lea.vmem %s36_s22, 128  ;;  %p1261_p4 = scmp.lt.s32.totalorder %s36_s22, %s36_s22 }
   0xd   :  { %p1257_p3 = scmp.ne.s32.totalorder %s36_s22, %s1256_s8  ;;  %p1262_p5 = scmp.lt.s32.totalorder %s1256_s8, %s1256_s8 }
   0xf   :  { %p1263_p6 = por %p1262_p5, %p1261_p4 }
  0x11   :  { %p1264_p7 = pnand %p1263_p6, %p1257_p3 }
  0x13   :  { %1267 = shalt.err (!%p1264_p7)
}
  0x14   :  { %38 = dma.hbm_to_vmem [thread:$0]  %s1685_s1, 128, %s36_s22, [#allocation6]  }
  0x15   :  { %s1268_s13 = scalar_lea.hbm %s1684_s0, 1024 }
  0x16   :  { %p1269_p8 = scmp.ne.s32.totalorder %s1684_s0, %s1268_s13  ;;  %p1272_p9 = scmp.lt.u32.totalorder %s1268_s13, %s1684_s0 }
  0x18   :  { %p1274_p10 = pnand %p1272_p9, %p1269_p8 }
  0x1a   :  { %1277 = shalt.err (!%p1274_p10)
}
  0x1b   :  { %s1278_s18 = scalar_lea.vmem %s1460_s24, 1024  ;;  %p1283_p12 = scmp.lt.s32.totalorder %s1460_s24, %s1460_s24 }
  0x1c   :  { %p1279_p11 = scmp.ne.s32.totalorder %s1460_s24, %s1278_s18  ;;  %p1284_p13 = scmp.lt.s32.totalorder %s1278_s18, %s1278_s18 }
  0x1e   :  { %p1285_p0 = por %p1284_p13, %p1283_p12 }
  0x20   :  { %p1286_p1 = pnand %p1285_p0, %p1279_p11 }
  0x22   :  { %1289 = shalt.err (!%p1286_p1)
}
  0x23   :  { %s1412_s1 = smov 128   ;;  %s1413_s19 = smov 8  }
  0x24   :  { %28 = dma.hbm_to_vmem [thread:$0]  %s1684_s0, 1024, %s1460_s24, [#allocation3], %s1412_s1, %s1412_s1, %s1413_s19  }
  0x25   :  { %s1414_s22 = smov [#allocation7]   ;;  %s1415_s25 = smov [#allocation8]  }
  0x26   :  { %s45_s23 = sshll.u32 %s1414_s22, 4  ;;  %s54_s26 = sshll.u32 %s1415_s25, 4  ;;  %s46_s23 = int_to_ptr.vmem [resolvable:$true] %s45_s23  ;;  %s1494_s26 = int_to_ptr.vmem [resolvable:$true] %s54_s26 }
  0x27   :  { %s1290_s29 = scalar_lea.hbm %s1686_s2, 128 }
  0x28   :  { %p1291_p2 = scmp.ne.s32.totalorder %s1686_s2, %s1290_s29  ;;  %p1294_p3 = scmp.lt.u32.totalorder %s1290_s29, %s1686_s2 }
  0x2a   :  { %p1296_p4 = pnand %p1294_p3, %p1291_p2 }
  0x2c   :  { %1299 = shalt.err (!%p1296_p4)
}
  0x2d   :  { %s1300_s0 = scalar_lea.vmem %s46_s23, 128  ;;  %p1305_p6 = scmp.lt.s32.totalorder %s46_s23, %s46_s23 }
  0x2e   :  { %p1301_p5 = scmp.ne.s32.totalorder %s46_s23, %s1300_s0  ;;  %p1306_p7 = scmp.lt.s32.totalorder %s1300_s0, %s1300_s0 }
  0x30   :  { %p1307_p8 = por %p1306_p7, %p1305_p6 }
  0x32   :  { %p1308_p9 = pnand %p1307_p8, %p1301_p5 }
  0x34   :  { %1311 = shalt.err (!%p1308_p9)
}
  0x35   :  { %48 = dma.hbm_to_vmem [thread:$0]  %s1686_s2, 128, %s46_s23, [#allocation6]  }
  0x36   :  { %s1312_s13 = scalar_lea.hbm %s1687_s3, 512 }
  0x37   :  { %p1313_p10 = scmp.ne.s32.totalorder %s1687_s3, %s1312_s13  ;;  %p1316_p11 = scmp.lt.u32.totalorder %s1312_s13, %s1687_s3 }
  0x39   :  { %p1318_p12 = pnand %p1316_p11, %p1313_p10 }
  0x3b   :  { %1321 = shalt.err (!%p1318_p12)
}
  0x3c   :  { %s1322_s18 = scalar_lea.vmem %s1494_s26, 512  ;;  %p1327_p0 = scmp.lt.s32.totalorder %s1494_s26, %s1494_s26 }
  0x3d   :  { %p1323_p13 = scmp.ne.s32.totalorder %s1494_s26, %s1322_s18  ;;  %p1328_p1 = scmp.lt.s32.totalorder %s1322_s18, %s1322_s18 }
  0x3f   :  { %p1329_p2 = por %p1328_p1, %p1327_p0 }
  0x41   :  { %p1330_p3 = pnand %p1329_p2, %p1323_p13 }
  0x43   :  { %1333 = shalt.err (!%p1330_p3)
}
  0x44   :  { %60 = dma.hbm_to_vmem [thread:$0]  %s1687_s3, 512, %s1494_s26, [#allocation9], %s1412_s1, %s1412_s1, %s1413_s19  }
  0x45   :  { %1400 = dma.done.wait [#allocation3], 1024  }
  0x46   :  { %1401 = vsyncadd [#allocation3], 4294966272 }
  0x47   :  { %1402 = dma.done.wait [#allocation6], 256  }
  0x48   :  { %1403 = vsyncadd [#allocation6], 4294967040 }
  0x49   :  { %1404 = dma.done.wait [#allocation9], 512  }
  0x4a   :  { %1405 = vsyncadd [#allocation9], 4294966784  ;;  %v1416_v0 = vmov 0.0|0.0   ;;  %vm1417_vm0 = vmmov 0   ;;  %v1418_v1 = vmov 0.0   ;;  %v73_v2 = vld [vmem:[#allocation8] sm:$0xff] }
  0x4b   :  { %1119 = vmatprep.subr.bf16.mxu0 %v1416_v0  ;;  %1039 = vmatprep.mubr.msk.f32.mxu0 %vm1417_vm0, %v1418_v1  ;;  %v74_v3 = vld [vmem:[#allocation8 + $0x8] sm:$0xff]  ;;  %v75_v4 = vld [vmem:[#allocation8 + $0x10] sm:$0xff]  ;;  %v76_v6 = vld [vmem:[#allocation8 + $0x18] sm:$0xff]  ;;  %vm80_vm1 = vcmask 261120   ;;  %s1419_s3 = smov 64   ;;  %s1420_s21 = smov 32  }
  0x4c   :  { %1125 = vmatprep.subr.bf16.mxu1 %v1416_v0  ;;  %1050 = vmatprep.mubr.msk.f32.mxu1 %vm1417_vm0, %v1418_v1  ;;  %v1534_v5 = vpack.c.bf16 %v74_v3, %v73_v2  ;;  %v1537_v7 = vpack.c.bf16 %v76_v6, %v75_v4  ;;  %v77_v8 = vld [vmem:[#allocation5] sm:$0xff]  ;;  %v78_v14 = vld [vmem:[#allocation7] sm:$0xff]  ;;  %v294_v47 = vld [vmem:[#allocation2 + $0x10] sm:$0xff]  ;;  %s1421_s22 = smov 96   ;;  %s1422_s23 = smov [#allocation11]  }
  0x4d   :  { %v79_v9 = vld [vmem:[#allocation2] sm:$0xff]  ;;  %v189_v29 = vld [vmem:[#allocation2 + $0x8] sm:$0xff]  ;;  %v399_v3 = vld [vmem:[#allocation2 + $0x18] sm:$0xff]  ;;  %s947_s25 = sshll.u32 %s1422_s23, 4  ;;  %s1423_s26 = smov [#allocation10]   ;;  %s948_s25 = int_to_ptr.vmem [resolvable:$true] %s947_s25 }
  0x4e   :  { %1121 = vmatpush3.bf16.msra.mxu0 %v1534_v5  ;;  %1127 = vmatpush3.bf16.msra.mxu1 %v1534_v5  ;;  %s934_s27 = sshll.u32 %s1423_s26, 4  ;;  %s1424_s28 = smov [#allocation13]   ;;  %s1629_s27 = int_to_ptr.vmem [resolvable:$true] %s934_s27 }
  0x4f   :  { %1122 = vmatprep.subr.bf16.mxu0 %v1416_v0  ;;  %1128 = vmatprep.subr.bf16.mxu1 %v1416_v0  ;;  %s957_s29 = sshll.u32 %s1424_s28, 4  ;;  %s1334_s30 = scalar_lea.vmem %s948_s25, 128  ;;  %s1633_s29 = int_to_ptr.vmem [resolvable:$true] %s957_s29 }
  0x50   :  { %p1335_p4 = scmp.ne.s32.totalorder %s948_s25, %s1334_s30  ;;  %p1339_p5 = scmp.lt.s32.totalorder %s948_s25, %s948_s25 }
  0x51   :  { %p1340_p6 = scmp.lt.s32.totalorder %s1334_s30, %s1334_s30 }
  0x52   :  { %1124 = vmatpush3.bf16.msra.mxu0 %v1537_v7  ;;  %1130 = vmatpush3.bf16.msra.mxu1 %v1537_v7 }
  0x53   :  { %1131 = vmatprep.subr.bf16.mxu0 %v1416_v0  ;;  %1137 = vmatprep.subr.bf16.mxu1 %v1416_v0  ;;  %p1341_p7 = por %p1340_p6, %p1339_p5 }
  0x55   :  { %1040 = vmatmul.mubr.msk.f32.vlgmr.msra.gmra.mrb[0].mxu0 %vm80_vm1, %v77_v8  ;;  %p1342_p8 = pnand %p1341_p7, %p1335_p4 }
  0x56   :  { %1133 = vmatpush3.bf16.msra.mxu0 %v1534_v5  ;;  %1061 = vmatprep.mubr.msk.f32.mxu0 %vm1417_vm0, %v1418_v1 }
  0x57   :  { %1134 = vmatprep.subr.bf16.mxu0 %v1416_v0 }
  0x5a   :  { %1136 = vmatpush3.bf16.msra.mxu0 %v1537_v7 }
  0x5b   :  { %1143 = vmatprep.subr.bf16.mxu0 %v1416_v0 }
 0x128   :  { %v150_v10 = vpop.f32.mrb[0].mxu0 }
 0x129   :  { %v154_v11 = vadd.f32 %v150_v10, %v79_v9  ;;  %v1041_v12 = vpop.f32.mrb[1].mxu0 }
 0x12b   :  { %1182 = vtanh.f32 %v154_v11  ;;  %v976_v15 = vmul.f32 -1.442695, %v154_v11 }
 0x12d   :  { %1184 = vpow2.f32 %v976_v15 }
 0x135   :  { %v1183_v13 = vpop.eup %1182 }
 0x136   :  { %168 = vrot.lane.b32.xlu0 %v1183_v13, %s1419_s3 }
 0x137   :  { %v1185_v16 = vpop.eup %1184 }
 0x138   :  { %v158_v17 = vadd.f32 1.0, %v1185_v16 }
 0x13a   :  { %163 = vrot.lane.b32.xlu0 %v78_v14, %s1420_s21  ;;  %1186 = vrcp.f32 %v158_v17 }
 0x144   :  { %v1187_v18 = vpop.eup %1186 }
 0x1a8   :  { %v169_v19 = vpop.permute.xlu0 %168 }
 0x1a9   :  { %v171_v20 = vmul.f32 %v1187_v18, %v169_v19 }
 0x1ab   :  { %173 = vrot.lane.b32.xlu1 %v171_v20, %s1420_s21 }
 0x1ac   :  { %v164_v21 = vpop.permute.xlu0 %163 }
 0x1ad   :  { %v166_v22 = vmul.f32 %v1187_v18, %v164_v21 }
 0x21d   :  { %v174_v23 = vpop.permute.xlu1 %173 }
 0x21e   :  { %v176_v24 = vadd.f32 %v174_v23, %v166_v22  ;;  %v504_v23 = vld [vmem:[#allocation2 + $0x20] sm:$0xff] }
 0x220   :  { %1188 = vtanh.f32 %v176_v24 }
 0x22a   :  { %v1189_v25 = vpop.eup %1188 }
 0x22b   :  { %179 = vrot.lane.b32.xlu1 %v1189_v25, %s1419_s3 }
 0x29d   :  { %v180_v26 = vpop.permute.xlu1 %179 }
 0x29e   :  { %v182_v27 = vmul.f32 %v1187_v18, %v180_v26 }
 0x2a0   :  { %184 = vrot.lane.b32.xlu0 %v182_v27, %s1420_s21 }
 0x312   :  { %v185_v28 = vpop.permute.xlu0 %184 }
 0x313   :  { %187 = vst.msk [vmem:[#allocation10] sm:$0xff] %vm80_vm1, %v185_v28  ;;  %1051 = vmatmul.mubr.msk.f32.vlgmr.msra.gmra.mrb[0].mxu1 %vm80_vm1, %v185_v28 }
 0x314   :  { %1139 = vmatpush3.bf16.msra.mxu1 %v1534_v5  ;;  %1072 = vmatprep.mubr.msk.f32.mxu1 %vm1417_vm0, %v1418_v1 }
 0x315   :  { %1140 = vmatprep.subr.bf16.mxu1 %v1416_v0 }
 0x318   :  { %1142 = vmatpush3.bf16.msra.mxu1 %v1537_v7 }
 0x319   :  { %1149 = vmatprep.subr.bf16.mxu1 %v1416_v0 }
 0x3e6   :  { %v258_v30 = vpop.f32.mrb[0].mxu1 }
 0x3e7   :  { %v262_v31 = vadd.f32 %v258_v30, %v189_v29  ;;  %v1052_v32 = vpop.f32.mrb[1].mxu1 }
 0x3e9   :  { %1190 = vtanh.f32 %v262_v31  ;;  %v978_v34 = vmul.f32 -1.442695, %v262_v31 }
 0x3eb   :  { %1192 = vpow2.f32 %v978_v34 }
 0x3f3   :  { %v1191_v33 = vpop.eup %1190 }
 0x3f4   :  { %272 = vrot.lane.b32.xlu1 %v1191_v33, %s1419_s3 }
 0x3f5   :  { %v1193_v35 = vpop.eup %1192 }
 0x3f6   :  { %v266_v36 = vadd.f32 1.0, %v1193_v35 }
 0x3f8   :  { %1194 = vrcp.f32 %v266_v36 }
 0x402   :  { %v1195_v37 = vpop.eup %1194 }
 0x403   :  { %v270_v40 = vmul.f32 %v1195_v37, %v176_v24 }
 0x466   :  { %v273_v38 = vpop.permute.xlu1 %272 }
 0x467   :  { %v275_v39 = vmul.f32 %v1195_v37, %v273_v38 }
 0x469   :  { %277 = vrot.lane.b32.xlu0 %v275_v39, %s1420_s21 }
 0x4db   :  { %v278_v41 = vpop.permute.xlu0 %277 }
 0x4dc   :  { %v280_v42 = vadd.f32 %v278_v41, %v270_v40  ;;  %v609_v41 = vld [vmem:[#allocation2 + $0x28] sm:$0xff] }
 0x4de   :  { %1196 = vtanh.f32 %v280_v42 }
 0x4e8   :  { %v1197_v43 = vpop.eup %1196 }
 0x4e9   :  { %283 = vrot.lane.b32.xlu1 %v1197_v43, %s1419_s3 }
 0x55b   :  { %v284_v44 = vpop.permute.xlu1 %283 }
 0x55c   :  { %v286_v45 = vmul.f32 %v1195_v37, %v284_v44 }
 0x55e   :  { %288 = vrot.lane.b32.xlu0 %v286_v45, %s1420_s21 }
 0x5d0   :  { %v289_v46 = vpop.permute.xlu0 %288 }
 0x5d1   :  { %292 = vst.msk [vmem:[#allocation10 + $0x8] sm:$0xff] %vm80_vm1, %v289_v46  ;;  %1062 = vmatmul.mubr.msk.f32.vlgmr.msra.gmra.mrb[2].mxu0 %vm80_vm1, %v289_v46 }
 0x5d2   :  { %1145 = vmatpush3.bf16.msra.mxu0 %v1534_v5  ;;  %1083 = vmatprep.mubr.msk.f32.mxu0 %vm1417_vm0, %v1418_v1 }
 0x5d3   :  { %1146 = vmatprep.subr.bf16.mxu0 %v1416_v0 }
 0x5d6   :  { %1148 = vmatpush3.bf16.msra.mxu0 %v1537_v7 }
 0x5d7   :  { %1155 = vmatprep.subr.bf16.mxu0 %v1416_v0 }
 0x6a4   :  { %v363_v48 = vpop.f32.mrb[2].mxu0 }
 0x6a5   :  { %v367_v49 = vadd.f32 %v363_v48, %v294_v47  ;;  %v1063_v50 = vpop.f32.mrb[3].mxu0 }
 0x6a7   :  { %1198 = vtanh.f32 %v367_v49  ;;  %v980_v52 = vmul.f32 -1.442695, %v367_v49 }
 0x6a9   :  { %1200 = vpow2.f32 %v980_v52 }
 0x6b1   :  { %v1199_v51 = vpop.eup %1198 }
 0x6b2   :  { %377 = vrot.lane.b32.xlu1 %v1199_v51, %s1419_s3 }
 0x6b3   :  { %v1201_v53 = vpop.eup %1200 }
 0x6b4   :  { %v371_v54 = vadd.f32 1.0, %v1201_v53 }
 0x6b6   :  { %1202 = vrcp.f32 %v371_v54 }
 0x6c0   :  { %v1203_v55 = vpop.eup %1202 }
 0x6c1   :  { %v375_v58 = vmul.f32 %v1203_v55, %v280_v42 }
 0x724   :  { %v378_v56 = vpop.permute.xlu1 %377 }
 0x725   :  { %v380_v57 = vmul.f32 %v1203_v55, %v378_v56 }
 0x727   :  { %382 = vrot.lane.b32.xlu0 %v380_v57, %s1420_s21 }
 0x799   :  { %v383_v59 = vpop.permute.xlu0 %382 }
 0x79a   :  { %v385_v60 = vadd.f32 %v383_v59, %v375_v58 }
 0x79c   :  { %1204 = vtanh.f32 %v385_v60 }
 0x7a6   :  { %v1205_v61 = vpop.eup %1204 }
 0x7a7   :  { %388 = vrot.lane.b32.xlu1 %v1205_v61, %s1419_s3 }
 0x819   :  { %v389_v62 = vpop.permute.xlu1 %388 }
 0x81a   :  { %v391_v63 = vmul.f32 %v1203_v55, %v389_v62  ;;  %v714_v55 = vld [vmem:[#allocation2 + $0x30] sm:$0xff] }
 0x81c   :  { %393 = vrot.lane.b32.xlu0 %v391_v63, %s1420_s21 }
 0x88e   :  { %v394_v2 = vpop.permute.xlu0 %393 }
 0x88f   :  { %397 = vst.msk [vmem:[#allocation10 + $0x10] sm:$0xff] %vm80_vm1, %v394_v2  ;;  %1073 = vmatmul.mubr.msk.f32.vlgmr.msra.gmra.mrb[2].mxu1 %vm80_vm1, %v394_v2 }
 0x890   :  { %1151 = vmatpush3.bf16.msra.mxu1 %v1534_v5  ;;  %1094 = vmatprep.mubr.msk.f32.mxu1 %vm1417_vm0, %v1418_v1 }
 0x891   :  { %1152 = vmatprep.subr.bf16.mxu1 %v1416_v0 }
 0x894   :  { %1154 = vmatpush3.bf16.msra.mxu1 %v1537_v7 }
 0x895   :  { %1161 = vmatprep.subr.bf16.mxu1 %v1416_v0 }
 0x962   :  { %v468_v4 = vpop.f32.mrb[2].mxu1 }
 0x963   :  { %v472_v6 = vadd.f32 %v468_v4, %v399_v3  ;;  %v1074_v8 = vpop.f32.mrb[3].mxu1 }
 0x965   :  { %1206 = vtanh.f32 %v472_v6  ;;  %v982_v10 = vmul.f32 -1.442695, %v472_v6 }
 0x967   :  { %1208 = vpow2.f32 %v982_v10 }
 0x96f   :  { %v1207_v9 = vpop.eup %1206 }
 0x970   :  { %482 = vrot.lane.b32.xlu1 %v1207_v9, %s1419_s3 }
 0x971   :  { %v1209_v11 = vpop.eup %1208 }
 0x972   :  { %v476_v12 = vadd.f32 1.0, %v1209_v11 }
 0x974   :  { %1210 = vrcp.f32 %v476_v12 }
 0x97e   :  { %v1211_v13 = vpop.eup %1210 }
 0x97f   :  { %v480_v16 = vmul.f32 %v1211_v13, %v385_v60 }
 0x9e2   :  { %v483_v14 = vpop.permute.xlu1 %482 }
 0x9e3   :  { %v485_v15 = vmul.f32 %v1211_v13, %v483_v14 }
 0x9e5   :  { %487 = vrot.lane.b32.xlu0 %v485_v15, %s1420_s21 }
 0xa57   :  { %v488_v17 = vpop.permute.xlu0 %487 }
 0xa58   :  { %v490_v18 = vadd.f32 %v488_v17, %v480_v16 }
 0xa5a   :  { %1212 = vtanh.f32 %v490_v18 }
 0xa64   :  { %v1213_v19 = vpop.eup %1212 }
 0xa65   :  { %493 = vrot.lane.b32.xlu1 %v1213_v19, %s1419_s3 }
 0xad7   :  { %v494_v20 = vpop.permute.xlu1 %493 }
 0xad8   :  { %v496_v21 = vmul.f32 %v1211_v13, %v494_v20  ;;  %v819_v13 = vld [vmem:[#allocation2 + $0x38] sm:$0xff] }
 0xada   :  { %498 = vrot.lane.b32.xlu0 %v496_v21, %s1420_s21 }
 0xb4c   :  { %v499_v22 = vpop.permute.xlu0 %498 }
 0xb4d   :  { %502 = vst.msk [vmem:[#allocation10 + $0x18] sm:$0xff] %vm80_vm1, %v499_v22  ;;  %1084 = vmatmul.mubr.msk.f32.vlgmr.msra.gmra.mrb[4].mxu0 %vm80_vm1, %v499_v22 }
 0xb4e   :  { %1157 = vmatpush3.bf16.msra.mxu0 %v1534_v5  ;;  %1105 = vmatprep.mubr.msk.f32.mxu0 %vm1417_vm0, %v1418_v1 }
 0xb4f   :  { %1158 = vmatprep.subr.bf16.mxu0 %v1416_v0 }
 0xb52   :  { %1160 = vmatpush3.bf16.msra.mxu0 %v1537_v7 }
 0xc20   :  { %v573_v24 = vpop.f32.mrb[4].mxu0 }
 0xc21   :  { %v577_v25 = vadd.f32 %v573_v24, %v504_v23  ;;  %v1085_v26 = vpop.f32.mrb[5].mxu0 }
 0xc23   :  { %1214 = vtanh.f32 %v577_v25  ;;  %v984_v28 = vmul.f32 -1.442695, %v577_v25 }
 0xc25   :  { %1216 = vpow2.f32 %v984_v28 }
 0xc2d   :  { %v1215_v27 = vpop.eup %1214 }
 0xc2e   :  { %587 = vrot.lane.b32.xlu1 %v1215_v27, %s1419_s3 }
 0xc2f   :  { %v1217_v29 = vpop.eup %1216 }
 0xc30   :  { %v581_v30 = vadd.f32 1.0, %v1217_v29 }
 0xc32   :  { %1218 = vrcp.f32 %v581_v30 }
 0xc3c   :  { %v1219_v31 = vpop.eup %1218 }
 0xc3d   :  { %v585_v34 = vmul.f32 %v1219_v31, %v490_v18 }
 0xca0   :  { %v588_v32 = vpop.permute.xlu1 %587 }
 0xca1   :  { %v590_v33 = vmul.f32 %v1219_v31, %v588_v32 }
 0xca3   :  { %592 = vrot.lane.b32.xlu0 %v590_v33, %s1420_s21 }
 0xd15   :  { %v593_v35 = vpop.permute.xlu0 %592 }
 0xd16   :  { %v595_v36 = vadd.f32 %v593_v35, %v585_v34 }
 0xd18   :  { %1220 = vtanh.f32 %v595_v36 }
 0xd22   :  { %v1221_v37 = vpop.eup %1220 }
 0xd23   :  { %598 = vrot.lane.b32.xlu1 %v1221_v37, %s1419_s3 }
 0xd95   :  { %v599_v38 = vpop.permute.xlu1 %598 }
 0xd96   :  { %v601_v39 = vmul.f32 %v1219_v31, %v599_v38 }
 0xd98   :  { %603 = vrot.lane.b32.xlu0 %v601_v39, %s1420_s21 }
 0xe0a   :  { %v604_v40 = vpop.permute.xlu0 %603 }
 0xe0b   :  { %607 = vst.msk [vmem:[#allocation10 + $0x20] sm:$0xff] %vm80_vm1, %v604_v40  ;;  %1095 = vmatmul.mubr.msk.f32.vlgmr.msra.gmra.mrb[4].mxu1 %vm80_vm1, %v604_v40 }
 0xe0c   :  { %1163 = vmatpush3.bf16.msra.mxu1 %v1534_v5  ;;  %1116 = vmatprep.mubr.msk.f32.mxu1 %vm1417_vm0, %v1418_v1 }
 0xe0d   :  { %1164 = vmatprep.subr.bf16.mxu1 %v1416_v0 }
 0xe10   :  { %1166 = vmatpush3.bf16.msra.mxu1 %v1537_v7 }
 0xede   :  { %v678_v42 = vpop.f32.mrb[4].mxu1 }
 0xedf   :  { %v682_v43 = vadd.f32 %v678_v42, %v609_v41  ;;  %v1096_v44 = vpop.f32.mrb[5].mxu1 }
 0xee1   :  { %1222 = vtanh.f32 %v682_v43  ;;  %v986_v46 = vmul.f32 -1.442695, %v682_v43 }
 0xee3   :  { %1224 = vpow2.f32 %v986_v46 }
 0xeeb   :  { %v1223_v45 = vpop.eup %1222 }
 0xeec   :  { %692 = vrot.lane.b32.xlu1 %v1223_v45, %s1419_s3 }
 0xeed   :  { %v1225_v47 = vpop.eup %1224 }
 0xeee   :  { %v686_v48 = vadd.f32 1.0, %v1225_v47 }
 0xef0   :  { %1226 = vrcp.f32 %v686_v48 }
 0xefa   :  { %v1227_v5 = vpop.eup %1226 }
 0xefb   :  { %v690_v0 = vmul.f32 %v1227_v5, %v595_v36 }
 0xf5e   :  { %v693_v49 = vpop.permute.xlu1 %692 }
 0xf5f   :  { %v695_v1 = vmul.f32 %v1227_v5, %v693_v49 }
 0xf61   :  { %697 = vrot.lane.b32.xlu0 %v695_v1, %s1420_s21 }
 0xfd3   :  { %v698_v7 = vpop.permute.xlu0 %697 }
 0xfd4   :  { %v700_v50 = vadd.f32 %v698_v7, %v690_v0 }
 0xfd6   :  { %1228 = vtanh.f32 %v700_v50 }
 0xfe0   :  { %v1229_v51 = vpop.eup %1228 }
 0xfe1   :  { %703 = vrot.lane.b32.xlu1 %v1229_v51, %s1419_s3 }
0x1053   :  { %v704_v52 = vpop.permute.xlu1 %703 }
0x1054   :  { %v706_v53 = vmul.f32 %v1227_v5, %v704_v52 }
0x1056   :  { %708 = vrot.lane.b32.xlu0 %v706_v53, %s1420_s21 }
0x10c8   :  { %v709_v54 = vpop.permute.xlu0 %708 }
0x10c9   :  { %712 = vst.msk [vmem:[#allocation10 + $0x28] sm:$0xff] %vm80_vm1, %v709_v54  ;;  %1106 = vmatmul.mubr.msk.f32.vlgmr.msra.gmra.mrb[6].mxu0 %vm80_vm1, %v709_v54 }
0x119c   :  { %v783_v56 = vpop.f32.mrb[6].mxu0 }
0x119d   :  { %v787_v57 = vadd.f32 %v783_v56, %v714_v55  ;;  %v1107_v58 = vpop.f32.mrb[7].mxu0 }
0x119f   :  { %1230 = vtanh.f32 %v787_v57  ;;  %v988_v60 = vmul.f32 -1.442695, %v787_v57 }
0x11a1   :  { %1232 = vpow2.f32 %v988_v60 }
0x11a9   :  { %v1231_v59 = vpop.eup %1230 }
0x11aa   :  { %797 = vrot.lane.b32.xlu1 %v1231_v59, %s1419_s3 }
0x11ab   :  { %v1233_v61 = vpop.eup %1232 }
0x11ac   :  { %v791_v62 = vadd.f32 1.0, %v1233_v61 }
0x11ae   :  { %1234 = vrcp.f32 %v791_v62 }
0x11b8   :  { %v1235_v63 = vpop.eup %1234 }
0x11b9   :  { %v795_v4 = vmul.f32 %v1235_v63, %v700_v50 }
0x121c   :  { %v798_v2 = vpop.permute.xlu1 %797 }
0x121d   :  { %v800_v3 = vmul.f32 %v1235_v63, %v798_v2 }
0x121f   :  { %802 = vrot.lane.b32.xlu0 %v800_v3, %s1420_s21 }
0x1291   :  { %v803_v6 = vpop.permute.xlu0 %802 }
0x1292   :  { %v805_v8 = vadd.f32 %v803_v6, %v795_v4 }
0x1294   :  { %1236 = vtanh.f32 %v805_v8 }
0x129e   :  { %v1237_v9 = vpop.eup %1236 }
0x129f   :  { %808 = vrot.lane.b32.xlu1 %v1237_v9, %s1419_s3 }
0x1311   :  { %v809_v10 = vpop.permute.xlu1 %808 }
0x1312   :  { %v811_v11 = vmul.f32 %v1235_v63, %v809_v10 }
0x1314   :  { %813 = vrot.lane.b32.xlu0 %v811_v11, %s1420_s21 }
0x1386   :  { %v814_v12 = vpop.permute.xlu0 %813 }
0x1387   :  { %817 = vst.msk [vmem:[#allocation10 + $0x30] sm:$0xff] %vm80_vm1, %v814_v12  ;;  %1117 = vmatmul.mubr.msk.f32.vlgmr.msra.gmra.mrb[6].mxu1 %vm80_vm1, %v814_v12 }
0x145a   :  { %v888_v14 = vpop.f32.mrb[6].mxu1 }
0x145b   :  { %v892_v15 = vadd.f32 %v888_v14, %v819_v13  ;;  %v1118_v16 = vpop.f32.mrb[7].mxu1 }
0x145d   :  { %1238 = vtanh.f32 %v892_v15  ;;  %v990_v18 = vmul.f32 -1.442695, %v892_v15 }
0x145f   :  { %1240 = vpow2.f32 %v990_v18 }
0x1467   :  { %v1239_v17 = vpop.eup %1238 }
0x1468   :  { %902 = vrot.lane.b32.xlu1 %v1239_v17, %s1419_s3 }
0x1469   :  { %v1241_v19 = vpop.eup %1240 }
0x146a   :  { %v896_v20 = vadd.f32 1.0, %v1241_v19 }
0x146c   :  { %1242 = vrcp.f32 %v896_v20 }
0x1476   :  { %v1243_v21 = vpop.eup %1242 }
0x1477   :  { %v900_v24 = vmul.f32 %v1243_v21, %v805_v8 }
0x14da   :  { %v903_v22 = vpop.permute.xlu1 %902 }
0x14db   :  { %v905_v23 = vmul.f32 %v1243_v21, %v903_v22 }
0x14dd   :  { %907 = vrot.lane.b32.xlu0 %v905_v23, %s1420_s21 }
0x154f   :  { %v908_v25 = vpop.permute.xlu0 %907 }
0x1550   :  { %v910_v26 = vadd.f32 %v908_v25, %v900_v24 }
0x1552   :  { %1244 = vtanh.f32 %v910_v26 }
0x155c   :  { %v1245_v27 = vpop.eup %1244 }
0x155d   :  { %913 = vrot.lane.b32.xlu1 %v1245_v27, %s1419_s3 }
0x1561   :  { %925 = vrot.lane.b32.xlu1 %v910_v26, %s1421_s22 }
0x15cf   :  { %v914_v28 = vpop.permute.xlu1 %913 }
0x15d0   :  { %v916_v29 = vmul.f32 %v1243_v21, %v914_v28 }
0x15d2   :  { %918 = vrot.lane.b32.xlu0 %v916_v29, %s1420_s21 }
0x15d3   :  { %v926_v30 = vpop.permute.xlu1 %925 }
0x15d4   :  { %928 = vst.msk [vmem:[#allocation13] sm:$0xff] %vm80_vm1, %v926_v30 }
0x1644   :  { %v919_v31 = vpop.permute.xlu0 %918 }
0x1645   :  { %922 = vst.msk [vmem:[#allocation10 + $0x38] sm:$0xff] %vm80_vm1, %v919_v31  ;;  %923 = vst.msk [vmem:[#allocation11] sm:$0xff] %vm80_vm1, %v919_v31 }
0x1646   :  { %1345 = shalt.err (!%p1342_p8)
}
0x1647   :  { %s1346_s9 = scalar_lea.hbm %s1689_s5, 128 }
0x1648   :  { %p1347_p9 = scmp.ne.s32.totalorder %s1689_s5, %s1346_s9  ;;  %p1350_p10 = scmp.lt.u32.totalorder %s1346_s9, %s1689_s5 }
0x164a   :  { %p1352_p11 = pnand %p1350_p10, %p1347_p9 }
0x164c   :  { %1355 = shalt.err (!%p1352_p11)
}
0x164d   :  { %950 = dma.vmem_to_hbm [thread:$0]  %s948_s25, 128, %s1689_s5, [#allocation12]  }
0x164e   :  { %s1356_s14 = scalar_lea.vmem %s1629_s27, 1024  ;;  %p1361_p13 = scmp.lt.s32.totalorder %s1629_s27, %s1629_s27 }
0x164f   :  { %p1357_p12 = scmp.ne.s32.totalorder %s1629_s27, %s1356_s14  ;;  %p1362_p0 = scmp.lt.s32.totalorder %s1356_s14, %s1356_s14 }
0x1651   :  { %p1363_p1 = por %p1362_p0, %p1361_p13 }
0x1653   :  { %p1364_p2 = pnand %p1363_p1, %p1357_p12 }
0x1655   :  { %1367 = shalt.err (!%p1364_p2)
}
0x1656   :  { %s1368_s17 = scalar_lea.hbm %s1688_s4, 1024 }
0x1657   :  { %p1369_p3 = scmp.ne.s32.totalorder %s1688_s4, %s1368_s17  ;;  %p1372_p4 = scmp.lt.u32.totalorder %s1368_s17, %s1688_s4 }
0x1659   :  { %p1374_p5 = pnand %p1372_p4, %p1369_p3 }
0x165b   :  { %1377 = shalt.err (!%p1374_p5)
}
0x165c   :  { %940 = dma.vmem_to_hbm [thread:$0]  %s1629_s27, 1024, %s1688_s4, [#allocation4], %s1412_s1, %s1412_s1, %s1413_s19  }
0x165d   :  { %s1378_s22 = scalar_lea.vmem %s1633_s29, 128  ;;  %p1383_p7 = scmp.lt.s32.totalorder %s1633_s29, %s1633_s29 }
0x165e   :  { %p1379_p6 = scmp.ne.s32.totalorder %s1633_s29, %s1378_s22  ;;  %p1384_p8 = scmp.lt.s32.totalorder %s1378_s22, %s1378_s22 }
0x1660   :  { %p1385_p9 = por %p1384_p8, %p1383_p7 }
0x1662   :  { %p1386_p10 = pnand %p1385_p9, %p1379_p6 }
0x1664   :  { %1389 = shalt.err (!%p1386_p10)
}
0x1665   :  { %s1390_s26 = scalar_lea.hbm %s1690_s6, 128 }
0x1666   :  { %p1391_p11 = scmp.ne.s32.totalorder %s1690_s6, %s1390_s26  ;;  %p1394_p12 = scmp.lt.u32.totalorder %s1390_s26, %s1690_s6 }
0x1668   :  { %p1396_p13 = pnand %p1394_p12, %p1391_p11 }
0x166a   :  { %1399 = shalt.err (!%p1396_p13)
}
0x166b   :  { %960 = dma.vmem_to_hbm [thread:$0]  %s1633_s29, 128, %s1690_s6, [#allocation12]  }
0x166c   :  { %1406 = dma.done.wait [#allocation4], 1024  }
0x166d   :  { %1407 = vsyncadd [#allocation4], 4294966272 }
0x166e   :  { %1408 = dma.done.wait [#allocation12], 256  }
0x166f   :  { %1409 = vsyncadd [#allocation12], 4294967040 }
0x1670   :  { %970 = vsyncpa [#allocation3], 1 }
0x1671   :  { %971 = vsyncpa [#allocation6], 1 }
0x1672   :  { %972 = vsyncpa [#allocation9], 1 }
0x1673   :  { %973 = vsyncpa [#allocation4], 1 }
0x1674   :  { %974 = vsyncpa [#allocation12], 1 }

</bundles_post_ra>
